<compile_context>
chip_gen: v6e
topology: v6e:2x2x1
jax: 0.10.0
libtpu: 0.0.40
codegen_flags: <defaults>
</compile_context>

<pallas_src>
import numpy as np
import jax
import jax.numpy as jnp
from jax import lax
from jax.experimental import pallas as pl
from jax.experimental.pallas import tpu as pltpu


# ----------------------------------------------------------------------------
# HiPPO-LegT constants (numpy float64, deterministic — mirrors HiPPO_LegT.__init__)
# ----------------------------------------------------------------------------
def _transition_lmu(N):
    Q = np.arange(N, dtype=np.float64)
    R = (2 * Q + 1)[:, None]
    j, i = np.meshgrid(Q, Q)
    A = np.where(i < j, -1.0, (-1.0) ** (i - j + 1)) * R
    B = (-1.0) ** Q[:, None] * R
    return A, B


def _legendre_vander(x, N):
    # P_n(x) via the three-term recurrence (== scipy.special.eval_legendre).
    x = np.asarray(x, dtype=np.float64)
    out = np.zeros((x.shape[0], N), dtype=np.float64)
    out[:, 0] = 1.0
    if N > 1:
        out[:, 1] = x
    for k in range(2, N):
        out[:, k] = ((2 * k - 1) * x * out[:, k - 1] - (k - 1) * out[:, k - 2]) / k
    return out


def _hippo_legt(N, dt):
    A, B = _transition_lmu(N)
    I = np.eye(N)
    M = I - (dt / 2.0) * A
    Ad = np.linalg.solve(M, I + (dt / 2.0) * A)            # bilinear (Tustin) discretization
    Bd = np.linalg.solve(M, dt * B).squeeze(-1)
    vals = np.arange(0.0, 1.0, dt)
    eval_matrix = _legendre_vander(1.0 - 2.0 * vals, N)     # (len(vals), N)
    return Ad, Bd, eval_matrix


def make_branches(n_steps, n_pred_steps, window_size, multiscale, modes1):
    seq_len = min(n_pred_steps, n_steps)
    modes2 = min(modes1, seq_len // 2)                      # mode_type == 0: low modes
    P = n_pred_steps
    branches = []
    for n in window_size:
        for ms in multiscale:
            dt = 1.0 / n_pred_steps / ms
            A, Bv, ev = _hippo_legt(n, dt)
            L = min(ms * n_pred_steps, n_steps)
            t_idx = (n_pred_steps - 1) if n_steps >= n_pred_steps else (L - 1)
            branches.append(dict(N=n, L=L, M=modes2, P=P, t_idx=t_idx, A=A, B=Bv, ev=ev))
    return branches, modes2


def make_params(key, in_channels, window_size, multiscale, modes2):
    K = len(window_size) * len(multiscale)
    keys = jax.random.split(key, 2 * K + 2)
    spec = []
    idx = 0
    for n in window_size:
        for _ in multiscale:
            scale = 1.0 / (n * n)
            wre = scale * jax.random.uniform(keys[idx], (n, n, modes2), dtype=jnp.float32); idx += 1
            wim = scale * jax.random.uniform(keys[idx], (n, n, modes2), dtype=jnp.float32); idx += 1
            spec.append((wre, wim))
    bound = 1.0 / np.sqrt(K)
    mlp_w = jax.random.uniform(keys[idx], (1, K), minval=-bound, maxval=bound, dtype=jnp.float32); idx += 1
    mlp_b = jax.random.uniform(keys[idx], (1,), minval=-bound, maxval=bound, dtype=jnp.float32)
    return dict(
        affine_weight=jnp.ones((1, 1, in_channels), jnp.float32),
        affine_bias=jnp.zeros((1, 1, in_channels), jnp.float32),
        spec_weights=spec, mlp_w=mlp_w, mlp_b=mlp_b,
    )


# ----------------------------------------------------------------------------
# Init-time full fold: every branch, every timestep -> one (P, T) matrix
# ----------------------------------------------------------------------------
def prepare_fold_weight(params, branches, n_steps):
    """Fold ALL timesteps of every branch into a single (P, n_steps) matrix W so that
        y[:, p, bc] = sum_t W[p, t] * x_enc[t, bc]        (mlp bias handled in-kernel).
    Linear + time-invariant + zero initial state => exact collapse:
        branch_out = sum_l mlp_w[k] * evP @ G_l @ s_l,  s_l = sum_{tau<=l} A^{l-tau} B f_tau
                   = W_branch @ f,  W_branch[:, tau] = mlp_w[k] * evP @ S_tau @ B,
        S_tau = sum_{l>=tau} G_l A^{l-tau}   (backward recursion S_tau = G_tau + S_{tau+1} @ A).
    Done once per parameter update (init-time for inference), in float64 numpy."""
    T = n_steps
    P = branches[0]["P"]
    mlp_w = np.asarray(params["mlp_w"], np.float64)[0]
    W = np.zeros((P, T), np.float64)
    for k, (br, (wre_j, wim_j)) in enumerate(zip(branches, params["spec_weights"])):
        N, L, M, t_idx = br["N"], br["L"], br["M"], br["t_idx"]
        A, Bv = br["A"], br["B"]
        evP = br["ev"][-P:, :]                                       # (P, N)
        wreT = np.transpose(np.asarray(wre_j, np.float64), (2, 1, 0))  # (M, out, in)
        wimT = np.transpose(np.asarray(wim_j, np.float64), (2, 1, 0))
        l = np.arange(L)[:, None]
        m = np.arange(M)[None, :]
        ang = 2.0 * np.pi * l * m / L                                # forward-DFT phases
        fac = np.where(np.arange(M) == 0, 1.0, 2.0)                  # hermitian irfft factor
        ang_t = 2.0 * np.pi * np.arange(M) * t_idx / L
        dre = fac * np.cos(ang_t) / L
        dim = -fac * np.sin(ang_t) / L
        # irfft-at-t_idx coefficients folded into the per-mode complex mixing weights
        W1 = dre[:, None, None] * wreT + dim[:, None, None] * wimT
        W2 = dim[:, None, None] * wreT - dre[:, None, None] * wimT
        # per-timestep (out, in) spectral-path matrices
        G = (np.einsum("lm,moi->loi", np.cos(ang), W1)
             - np.einsum("lm,moi->loi", np.sin(ang), W2))            # (L, N, N)
        # S_tau = sum_{l>=tau} G_l A^{l-tau}
        S = np.empty_like(G)
        S[L - 1] = G[L - 1]
        for t in range(L - 2, -1, -1):
            S[t] = G[t] + S[t + 1] @ A
        Wk = mlp_w[k] * np.einsum("po,loi,i->pl", evP, S, Bv)        # (P, L)
        W[:, T - L:] += Wk                                           # branch consumes x[:, -L:]
    return jnp.asarray(W, jnp.float32)


# ----------------------------------------------------------------------------
# Pallas kernel: fused encode -> folded matmul -> combine
# ----------------------------------------------------------------------------
def film_fold_kernel(w_ref, aw_ref, ab_ref, sc_ref, off_ref, x_ref, o_ref):
    # w_ref  : (P, T)   fully-folded spectral/Legendre/mlp weight (grid-invariant, KiB-scale)
    # aw_ref : (1, BCt) instance-affine weight  (per flattened batch*channel lane)
    # ab_ref : (1, BCt) instance-affine bias
    # sc_ref : (1, BCt) 1 / (affine_weight + 1e-10)
    # off_ref: (1, BCt) (mlp_bias - affine_bias) * sc
    # x_ref  : (T, BCt) raw input slice, time-major, lane-dense BC tile
    # o_ref  : (P, BCt)
    x_enc = x_ref[...] * aw_ref[...] + ab_ref[...]                 # encode (VPU, free)
    # One MXU op replaces the old L-step serial recurrence.  HIGHEST precision is set
    # per-dot (no global config): the kernel is memory-bound, so the extra bf16 passes
    # hide under the x-tile DMA while guaranteeing the tolerance.
    y = jnp.dot(w_ref[...], x_enc,
                preferred_element_type=jnp.float32,
                precision=lax.Precision.HIGHEST)                   # (P, BCt)
    o_ref[...] = y * sc_ref[...] + off_ref[...]                    # combine (VPU, free)


# ----------------------------------------------------------------------------
# Forward wrapper
# ----------------------------------------------------------------------------
def _round_up(x, m):
    return ((x + m - 1) // m) * m


def _padded_tile_bytes(shape, itemsize=4):
    s = list(shape)
    s[-1] = _round_up(s[-1], 128)          # lane padding
    if len(s) >= 2:
        s[-2] = _round_up(s[-2], 8)        # sublane padding
    n = 1
    for d in s:
        n *= d
    return n * itemsize


def _vmem_limit_bytes(per_buffer_shapes):
    # Upper bound from (8,128)-padded, double-buffered tile sizes, sized against the
    # actual chip (64 MiB/TC on v7x, 128 MiB on v5e/v6e) with headroom.
    need = 2 * sum(_padded_tile_bytes(s) for s in per_buffer_shapes)
    try:
        cap = int(pltpu.get_tpu_info().vmem_capacity_bytes)
    except Exception:
        cap = 64 * 2**20                   # smallest current generation (v7x per-TC)
    return int(min(max(2 * need, 8 * 2**20), (3 * cap) // 4))


def backbone_film_forward(X, params, W_fold):
    B, T, C = X.shape
    BC = B * C
    P = W_fold.shape[0]

    aw = params["affine_weight"].reshape(-1)                       # (C,)
    ab = params["affine_bias"].reshape(-1)
    mlp_b = params["mlp_b"][0]

    # flattened (batch*channel) lane axis; per-channel affine broadcast over batch
    aw_bc = jnp.tile(aw, B)                                        # lane b*C + c -> aw[c]
    ab_bc = jnp.tile(ab, B)
    sc_bc = 1.0 / (aw_bc + 1e-10)
    off_bc = (mlp_b - ab_bc) * sc_bc

    # lane-dense tiling: up to 2048-lane tiles, >=2 tiles whenever BC allows so the
    # "parallel" grid axis can shard across v7x's two TensorCores and pipeline DMA.
    bc_min = _round_up(BC, 128)
    if bc_min >= 256:
        bc_tile = min(2048, _round_up(pl.cdiv(bc_min, 2), 128))
    else:
        bc_tile = bc_min
    bc_pad = _round_up(bc_min, bc_tile)
    n_tiles = bc_pad // bc_tile
    pad = bc_pad - BC

    x_lbc = jnp.transpose(X, (1, 0, 2)).reshape(T, BC)             # (T, B*C) time-major
    x_lbc = jnp.pad(x_lbc, ((0, 0), (0, pad)))
    aw_p = jnp.pad(aw_bc, (0, pad), constant_values=1.0)[None, :]
    ab_p = jnp.pad(ab_bc, (0, pad))[None, :]
    sc_p = jnp.pad(sc_bc, (0, pad), constant_values=1.0)[None, :]
    off_p = jnp.pad(off_bc, (0, pad))[None, :]

    vmem_limit = _vmem_limit_bytes([
        (P, T), (1, bc_tile), (1, bc_tile), (1, bc_tile), (1, bc_tile),
        (T, bc_tile), (P, bc_tile)])

    out = pl.pallas_call(
        film_fold_kernel,
        out_shape=jax.ShapeDtypeStruct((P, bc_pad), jnp.float32),
        grid_spec=pltpu.PrefetchScalarGridSpec(
            num_scalar_prefetch=0,
            grid=(n_tiles,),
            in_specs=[
                pl.BlockSpec((P, T), lambda j: (0, 0)),            # folded weight (invariant)
                pl.BlockSpec((1, bc_tile), lambda j: (0, j)),
                pl.BlockSpec((1, bc_tile), lambda j: (0, j)),
                pl.BlockSpec((1, bc_tile), lambda j: (0, j)),
                pl.BlockSpec((1, bc_tile), lambda j: (0, j)),
                pl.BlockSpec((T, bc_tile), lambda j: (0, j)),
            ],
            out_specs=pl.BlockSpec((P, bc_tile), lambda j: (0, j)),
        ),
        compiler_params=pltpu.CompilerParams(
            dimension_semantics=("parallel",),                     # BC tiles independent
            vmem_limit_bytes=vmem_limit,
        ),
    )(W_fold, aw_p, ab_p, sc_p, off_p, x_lbc)

    y = out[:, :BC]                                                # (P, BC)
    return jnp.transpose(y.reshape(P, B, C), (1, 0, 2))            # (B, P, C)


# ----------------------------------------------------------------------------
# Reference: op-for-op numpy/float64 mirror of the PyTorch forward (real FFTs)
# ----------------------------------------------------------------------------
def reference_forward_np(X, params, branches):
    X = np.asarray(X, np.float64)
    aw = np.asarray(params["affine_weight"], np.float64)
    ab = np.asarray(params["affine_bias"], np.float64)
    mlp_w = np.asarray(params["mlp_w"], np.float64)[0]
    mlp_b = float(np.asarray(params["mlp_b"], np.float64)[0])
    B, T, C = X.shape
    x_enc = X * aw + ab
    x_decs = []
    for br, (wre_j, wim_j) in zip(branches, params["spec_weights"]):
        N, L, M, t_idx, P = br["N"], br["L"], br["M"], br["t_idx"], br["P"]
        A, Bv, ev = br["A"], br["B"], br["ev"]
        wre = np.asarray(wre_j, np.float64)
        wim = np.asarray(wim_j, np.float64)
        x_in = x_enc[:, -L:, :]                                    # (B, L, C)
        inp = np.transpose(x_in, (0, 2, 1))                        # (B, C, L)
        c = np.zeros((B, C, N))
        states = []
        for t in range(L):                                         # HiPPO-LegT recurrence
            c = c @ A.T + inp[:, :, t][..., None] * Bv
            states.append(c)
        x_in_c = np.stack(states, axis=-1)                         # (B, C, N, L)
        x_ft = np.fft.rfft(x_in_c, axis=-1)
        a = x_ft[..., :M]
        w = wre + 1j * wim
        out_modes = np.einsum("bjix,iox->bjox", a, w)
        out_ft = np.zeros(x_in_c.shape[:-1] + (L // 2 + 1,), np.complex128)
        out_ft[..., :M] = out_modes
        out1 = np.fft.irfft(out_ft, n=L, axis=-1)                  # (B, C, N, L)
        x_dec_c = out1[..., t_idx]                                 # (B, C, N)
        x_decs.append(x_dec_c @ ev[-P:, :].T)                      # (B, C, P)
    xd = np.stack(x_decs, axis=-1)                                 # (B, C, P, K)
    y = xd @ mlp_w + mlp_b                                         # (B, C, P)
    y = np.transpose(y, (0, 2, 1))                                 # (B, P, C)
    return (y - ab) / (aw + 1e-10)


# ----------------------------------------------------------------------------
if __name__ == "__main__":
    # module hyper-parameters (small, consistent with BackboneFiLM.__init__)
    n_steps, in_channels, n_pred_steps = 16, 4, 8
    window_size, multiscale = [8], [1, 2]
    modes1 = 4                                   # ratio / mode_type unused (mode_type=0)
    batch = 2

    key = jax.random.PRNGKey(0)
    kx, kp = jax.random.split(key)
    X = jax.random.normal(kx, (batch, n_steps, in_channels), dtype=jnp.float32)

    branches, modes2 = make_branches(n_steps, n_pred_steps, window_size, multiscale, modes1)
    params = make_params(kp, in_channels, window_size, multiscale, modes2)
    W_fold = prepare_fold_weight(params, branches, n_steps)        # init-time full fold

    fwd = jax.jit(backbone_film_forward)
    out = jax.block_until_ready(fwd(X, params, W_fold))
    assert out.shape == (batch, n_pred_steps, in_channels), out.shape

    ref = reference_forward_np(X, params, branches)
    np.testing.assert_allclose(np.asarray(out), ref, rtol=5e-3, atol=5e-3)

    print("KERNEL_OK")
</pallas_src>

<mosaic_0001>
module attributes {stable_mosaic.version = 11 : i64} {
  func.func @film_fold_kernel(%arg0: i32, %arg1: memref<8x16xf32, #tpu.memory_space<vmem>>, %arg2: memref<1x128xf32, #tpu.memory_space<vmem>>, %arg3: memref<1x128xf32, #tpu.memory_space<vmem>>, %arg4: memref<1x128xf32, #tpu.memory_space<vmem>>, %arg5: memref<1x128xf32, #tpu.memory_space<vmem>>, %arg6: memref<16x128xf32, #tpu.memory_space<vmem>>, %arg7: memref<8x128xf32, #tpu.memory_space<vmem>>) attributes {dimension_semantics = [#tpu.dimension_semantics<parallel>], iteration_bounds = array<i64: 1>, scalar_prefetch = 0 : i64, scratch_operands = 0 : i64, tpu.core_type = #tpu.core_type<tc>, window_params = [{pipeline_mode = #tpu.pipeline_mode<synchronous>, transform_indices = @transform_0, window_bounds = array<i64: 8, 16>}, {transform_indices = @transform_1, window_bounds = array<i64: 1, 128>}, {transform_indices = @transform_2, window_bounds = array<i64: 1, 128>}, {transform_indices = @transform_3, window_bounds = array<i64: 1, 128>}, {transform_indices = @transform_4, window_bounds = array<i64: 1, 128>}, {transform_indices = @transform_5, window_bounds = array<i64: 16, 128>}, {transform_indices = @transform_6, window_bounds = array<i64: 8, 128>}]} {
    %c0 = arith.constant 0 : index
    %c0_0 = arith.constant 0 : index
    %0 = vector.load %arg6[%c0, %c0_0] : memref<16x128xf32, #tpu.memory_space<vmem>>, vector<16x128xf32>
    %c0_1 = arith.constant 0 : index
    %c0_2 = arith.constant 0 : index
    %1 = vector.load %arg2[%c0_1, %c0_2] : memref<1x128xf32, #tpu.memory_space<vmem>>, vector<1x128xf32>
    %2 = vector.broadcast %1 : vector<1x128xf32> to vector<16x128xf32>
    %3 = arith.mulf %0, %2 : vector<16x128xf32>
    %c0_3 = arith.constant 0 : index
    %c0_4 = arith.constant 0 : index
    %4 = vector.load %arg3[%c0_3, %c0_4] : memref<1x128xf32, #tpu.memory_space<vmem>>, vector<1x128xf32>
    %5 = vector.broadcast %4 : vector<1x128xf32> to vector<16x128xf32>
    %6 = arith.addf %3, %5 : vector<16x128xf32>
    %c0_5 = arith.constant 0 : index
    %c0_6 = arith.constant 0 : index
    %7 = vector.load %arg1[%c0_5, %c0_6] : memref<8x16xf32, #tpu.memory_space<vmem>>, vector<8x16xf32>
    %cst = arith.constant dense<0.000000e+00> : vector<8x128xf32>
    %8 = tpu.matmul %7, %6, %cst {dimension_numbers = #tpu.dot_dimension_numbers<[1], [0], [0], [1], [0, 0, 1, 1], [], []>, precision = #tpu.contract_precision<fp32>} : vector<8x16xf32>, vector<16x128xf32>, vector<8x128xf32> -> vector<8x128xf32>
    %c0_7 = arith.constant 0 : index
    %c0_8 = arith.constant 0 : index
    %9 = vector.load %arg4[%c0_7, %c0_8] : memref<1x128xf32, #tpu.memory_space<vmem>>, vector<1x128xf32>
    %10 = vector.broadcast %9 : vector<1x128xf32> to vector<8x128xf32>
    %11 = arith.mulf %8, %10 : vector<8x128xf32>
    %c0_9 = arith.constant 0 : index
    %c0_10 = arith.constant 0 : index
    %12 = vector.load %arg5[%c0_9, %c0_10] : memref<1x128xf32, #tpu.memory_space<vmem>>, vector<1x128xf32>
    %13 = vector.broadcast %12 : vector<1x128xf32> to vector<8x128xf32>
    %14 = arith.addf %11, %13 : vector<8x128xf32>
    %c0_11 = arith.constant 0 : index
    %c0_12 = arith.constant 0 : index
    %15 = vector.load %arg7[%c0_11, %c0_12] : memref<8x128xf32, #tpu.memory_space<vmem>>, vector<8x128xf32>
    tpu.vector_store %arg7[%c0_11, %c0_12], %14 {strides = array<i32>} : memref<8x128xf32, #tpu.memory_space<vmem>>, vector<8x128xf32>,
    return
  }
  func.func @transform_0(%arg0: i32) -> (i32, i32) {
    %c0_i32 = arith.constant 0 : i32
    %c0_i32_0 = arith.constant 0 : i32
    %c0_i32_1 = arith.constant 0 : i32
    return %c0_i32, %c0_i32_0 : i32, i32
  }
  func.func @transform_1(%arg0: i32) -> (i32, i32) {
    %c0_i32 = arith.constant 0 : i32
    %c0_i32_0 = arith.constant 0 : i32
    return %c0_i32, %arg0 : i32, i32
  }
  func.func @transform_2(%arg0: i32) -> (i32, i32) {
    %c0_i32 = arith.constant 0 : i32
    %c0_i32_0 = arith.constant 0 : i32
    return %c0_i32, %arg0 : i32, i32
  }
  func.func @transform_3(%arg0: i32) -> (i32, i32) {
    %c0_i32 = arith.constant 0 : i32
    %c0_i32_0 = arith.constant 0 : i32
    return %c0_i32, %arg0 : i32, i32
  }
  func.func @transform_4(%arg0: i32) -> (i32, i32) {
    %c0_i32 = arith.constant 0 : i32
    %c0_i32_0 = arith.constant 0 : i32
    return %c0_i32, %arg0 : i32, i32
  }
  func.func @transform_5(%arg0: i32) -> (i32, i32) {
    %c0_i32 = arith.constant 0 : i32
    %c0_i32_0 = arith.constant 0 : i32
    return %c0_i32, %arg0 : i32, i32
  }
  func.func @transform_6(%arg0: i32) -> (i32, i32) {
    %c0_i32 = arith.constant 0 : i32
    %c0_i32_0 = arith.constant 0 : i32
    return %c0_i32, %arg0 : i32, i32
  }
}

</mosaic_0001>

<bundles_post_ra>
// kernel: tile.14
= control target key start
LH: loop header
LB: loop body
LE: loop exit
PB: predicated region body
PF: predicated region fallthrough
CT: control target
= control target key end

     0   :  { %s22_s0 = inlined_call_operand.vmem [shape: f32[4], index: 0, kind: input, shape index: {}]   ;;  %s23_s1 = inlined_call_operand.vmem [shape: f32[2,4], index: 1, kind: output, shape index: {}]  }
   0x1   :  { %v4_v0 = vld [vmem:[%s22_s0] ss:$0 sm:$0xff] }
   0x2   :  { %5 = vst [vmem:[%s23_s1] sm:$0x3] %v4_v0 }

// kernel: tile.15
= control target key start
LH: loop header
LB: loop body
LE: loop exit
PB: predicated region body
PF: predicated region fallthrough
CT: control target
= control target key end

     0   :  { %vm8_vm0 = vcmask 31744   ;;  %vm14_vm1 = vcmask 64544   ;;  %s42_s0 = inlined_call_operand.vmem [shape: f32[2,4], index: 0, kind: input, shape index: {}]   ;;  %s43_s1 = inlined_call_operand.vmem [shape: f32[8], index: 1, kind: output, shape index: {}]  }
   0x1   :  { %v5_v0 = vld [vmem:[%s42_s0] sm:$0x3]  ;;  %s25_s0 = smov 4  }
   0x2   :  { %6 = vst [vmem:[#allocation1] sm:$0x3] %v5_v0 }
   0x9   :  { %v11_v1 = vld [vmem:[#allocation1 + $0x1] sm:$0x1]   ;;  %v7_v2 = vld [vmem:[#allocation1] sm:$0x1]  }
   0xa   :  { %12 = vrot.lane.b32.xlu0 %v11_v1, %s25_s0  ;;  %9 = vst.msk [vmem:[#allocation0] sm:$0x1] %vm8_vm0, %v7_v2  }
  0x7c   :  { %v13_v3 = vpop.permute.xlu0 %12  }
  0x7d   :  { %15 = vst.msk [vmem:[#allocation0] sm:$0x1] %vm14_vm1, %v13_v3  }
  0x84   :  { %v20_v4 = vld [vmem:[#allocation0] sm:$0x1] }
  0x85   :  { %23 = vst [vmem:[%s43_s1] sm:$0x1] %v20_v4 }

// kernel: backbone_film_forward.1
= control target key start
LH: loop header
LB: loop body
LE: loop exit
PB: predicated region body
PF: predicated region fallthrough
CT: control target
= control target key end

     0   :  { %vm44_vm0 = vcmask 130048   ;;  %v594_v0 = vmov 0.0   ;;  %vm595_vm1 = vmmov 0   ;;  %s661_s1 = inlined_call_operand.vmem [shape: f32[1,128], index: 1, kind: input, shape index: {}]   ;;  %s662_s2 = inlined_call_operand.vmem [shape: f32[1,128], index: 2, kind: input, shape index: {}]   ;;  %s663_s5 = inlined_call_operand.vmem [shape: f32[16,128], index: 5, kind: input, shape index: {}]   ;;  %s664_s0 = inlined_call_operand.vmem [shape: f32[8,16], index: 0, kind: input, shape index: {}]   ;;  %s665_s3 = inlined_call_operand.vmem [shape: f32[1,128], index: 3, kind: input, shape index: {}]   ;;  %s666_s4 = inlined_call_operand.vmem [shape: f32[1,128], index: 4, kind: input, shape index: {}]   ;;  %s667_s6 = inlined_call_operand.vmem [shape: f32[8,128], index: 6, kind: output, shape index: {}]  }
   0x1   :  { %550 = vmatprep.subr.mxu0 %v594_v0  ;;  %v24_v1 = vld [vmem:[%s663_s5 + $0x8] sm:$0xff]  ;;  %v528_v2 = vld [vmem:[%s661_s1] ss:$0 sm:$0xff]  ;;  %554 = vmatprep.mubr.msk.f32.mxu0 %vm595_vm1, %v594_v0 }
   0x2   :  { %v529_v3 = vld [vmem:[%s662_s2] ss:$0 sm:$0xff]  ;;  %v33_v4 = vmul.f32 %v528_v2, %v24_v1  ;;  %557 = vmatprep.subr.mxu1 %v594_v0  ;;  %561 = vmatprep.mubr.msk.f32.mxu1 %vm595_vm1, %v594_v0 }
   0x3   :  { %v23_v5 = vld [vmem:[%s663_s5] sm:$0xff] }
   0x4   :  { %v43_v6 = vld [vmem:[%s664_s0] sm:$0xff]  ;;  %v32_v7 = vmul.f32 %v528_v2, %v23_v5  ;;  %v42_v9 = vadd.f32 %v529_v3, %v33_v4 }
   0x5   :  { %v46_v8 = vsel %vm44_vm0, %v43_v6, 0  ;;  %v530_v41 = vld [vmem:[%s665_s3] ss:$0 sm:$0xff] }
   0x6   :  { %v115_v10 = vand.u32 4294901760, %v46_v8  ;;  %v41_v11 = vadd.f32 %v529_v3, %v32_v7  ;;  %v77_v12 = vand.u32 4294901760, %v42_v9  ;;  %v531_v43 = vld [vmem:[%s666_s4] ss:$0 sm:$0xff] }
   0x8   :  { %v116_v13 = vsub.f32 %v46_v8, %v115_v10  ;;  %v80_v14 = vand.u32 4294901760, %v41_v11  ;;  %551 = vmatpush3.msra.mxu0 %v77_v12  ;;  %v155_v16 = vsub.f32 %v42_v9, %v77_v12 }
   0x9   :  { %552 = vmatprep.subr.mxu0 %v594_v0 }
   0xa   :  { %v117_v15 = vand.u32 4294901760, %v116_v13  ;;  %v162_v17 = vsub.f32 %v41_v11, %v80_v14  ;;  %553 = vmatpush3.msra.mxu0 %v80_v14  ;;  %v156_v19 = vand.u32 4294901760, %v155_v16 }
   0xb   :  { %564 = vmatprep.subr.mxu0 %v594_v0 }
   0xc   :  { %v118_v18 = vsub.f32 %v116_v13, %v117_v15  ;;  %v163_v20 = vand.u32 4294901760, %v162_v17  ;;  %v157_v22 = vsub.f32 %v155_v16, %v156_v19 }
   0xe   :  { %v119_v21 = vand.u32 4294901760, %v118_v18  ;;  %v164_v23 = vsub.f32 %v162_v17, %v163_v20  ;;  %v158_v24 = vand.u32 4294901760, %v157_v22 }
  0x10   :  { %555 = vmatmul.mubr.f32.vlgmr.msra.gmra.mxu0 %v119_v21  ;;  %v165_v25 = vand.u32 4294901760, %v164_v23  ;;  %558 = vmatpush3.msra.mxu1 %v158_v24 }
  0x11   :  { %565 = vmatpush3.msra.mxu0 %v155_v16  ;;  %568 = vmatprep.mubr.msk.f32.mxu0 %vm595_vm1, %v594_v0 }
  0x12   :  { %566 = vmatprep.subr.mxu0 %v594_v0  ;;  %559 = vmatprep.subr.mxu1 %v594_v0 }
  0x13   :  { %567 = vmatpush3.msra.mxu0 %v162_v17  ;;  %560 = vmatpush3.msra.mxu1 %v165_v25 }
  0x14   :  { %569 = vmatmul.mubr.f32.vlgmr.msra.gmra.mxu0 %v116_v13  ;;  %562 = vmatmul.mubr.f32.vlgmr.msra.gmra.mxu1 %v115_v10 }
  0x15   :  { %571 = vmatprep.subr.mxu1 %v594_v0  ;;  %578 = vmatprep.subr.mxu0 %v594_v0 }
  0x16   :  { %572 = vmatpush3.msra.mxu1 %v77_v12  ;;  %579 = vmatpush3.msra.mxu0 %v156_v19 }
  0x17   :  { %573 = vmatprep.subr.mxu1 %v594_v0  ;;  %575 = vmatprep.mubr.msk.f32.mxu1 %vm595_vm1, %v594_v0 }
  0x18   :  { %574 = vmatpush3.msra.mxu1 %v80_v14  ;;  %580 = vmatprep.subr.mxu0 %v594_v0 }
  0x19   :  { %576 = vmatmul.mubr.f32.vlgmr.msra.gmra.mxu1 %v117_v15  ;;  %581 = vmatpush3.msra.mxu0 %v163_v20 }
  0x1a   :  { %582 = vmatprep.mubr.msk.f32.mxu0 %vm595_vm1, %v594_v0  ;;  %585 = vmatprep.subr.mxu1 %v594_v0 }
  0x1b   :  { %583 = vmatmul.mubr.f32.vlgmr.msra.gmra.mxu0 %v115_v10  ;;  %586 = vmatpush3.msra.mxu1 %v77_v12 }
  0x1c   :  { %589 = vmatprep.mubr.msk.f32.mxu1 %vm595_vm1, %v594_v0  ;;  %587 = vmatprep.subr.mxu1 %v594_v0 }
  0x1d   :  { %588 = vmatpush3.msra.mxu1 %v80_v14 }
  0x1e   :  { %590 = vmatmul.mubr.f32.vlgmr.msra.gmra.mxu1 %v115_v10 }
  0xd0   :  { %v121_v26 = vpop.f32.mrf.mxu0 }
  0xd2   :  { %v556_v27 = vpop.f32.mrf.mxu0 }
  0xd4   :  { %v278_v28 = vpop.f32.mrf.mxu0  ;;  %v202_v29 = vpop.f32.mrf.mxu1 }
  0xd5   :  { %v203_v30 = vadd.f32 %v202_v29, %v121_v26 }
  0xd6   :  { %v570_v31 = vpop.f32.mrf.mxu0  ;;  %v563_v32 = vpop.f32.mrf.mxu1 }
  0xd7   :  { %v279_v33 = vadd.f32 %v278_v28, %v203_v30 }
  0xd9   :  { %v353_v34 = vpop.f32.mrf.mxu1 }
  0xda   :  { %v354_v35 = vadd.f32 %v353_v34, %v279_v33 }
  0xdb   :  { %v430_v36 = vpop.f32.mrf.mxu0  ;;  %v577_v37 = vpop.f32.mrf.mxu1 }
  0xdc   :  { %v431_v38 = vadd.f32 %v430_v36, %v354_v35 }
  0xdd   :  { %v584_v39 = vpop.f32.mrf.mxu0 }
  0xde   :  { %v503_v40 = vpop.f32.mrf.mxu1 }
  0xdf   :  { %v504_v42 = vadd.f32 %v503_v40, %v431_v38 }
  0xe0   :  { %v591_v44 = vpop.f32.mrf.mxu1 }
  0xe1   :  { %v514_v45 = vmul.f32 %v530_v41, %v504_v42 }
  0xe3   :  { %v522_v46 = vadd.f32 %v531_v43, %v514_v45 }
  0xe5   :  { %523 = vst [vmem:[%s667_s6] sm:$0xff] %v522_v46 }

</bundles_post_ra>
